<compile_context>
chip_gen: v5e
topology: v5e:2x2
jax: 0.10.0
libtpu: 0.0.40
codegen_flags: <defaults>
</compile_context>

<pallas_src>
import jax
import jax.numpy as jnp
from jax.experimental import pallas as pl
from jax.experimental.pallas import tpu as pltpu


def _round_up(x, m):
    return ((x + m - 1) // m) * m


def _discriminator_kernel(xT_ref, w1_ref, b1_ref, w2_ref, b2_ref, w3_ref, b3_ref, o_ref):
    # Feature-major: activations are (features, TILE_B) -> batch on lane axis.
    xT = xT_ref[...]                                                       # (Din, TB)

    # layer 1: h = W1 @ x^T + b1 ; LeakyReLU(0.2)
    h = jnp.dot(w1_ref[...], xT, preferred_element_type=jnp.float32) + b1_ref[...]   # (H1, TB)
    h = jnp.where(h > 0, h, 0.2 * h)

    # layer 2: h = W2 @ h + b2 ; LeakyReLU(0.2)
    h = jnp.dot(w2_ref[...], h, preferred_element_type=jnp.float32) + b2_ref[...]    # (H2, TB)
    h = jnp.where(h > 0, h, 0.2 * h)

    # layer 3: y = W3 @ h + b3 ; sigmoid (exp/recip -> EUP, essentially free)
    y = jnp.dot(w3_ref[...], h, preferred_element_type=jnp.float32) + b3_ref[...]    # (1, TB)
    o_ref[...] = jax.nn.sigmoid(y)


def discriminator_forward(state, params, tile_b=512):
    """state: (B, state_dim + action_dim) f32.  params: torch-layout (out, in) weights.

    Returns (B, 1) f32, matching Discriminator.forward.
    """
    B, din = state.shape
    h1 = params["l1_w"].shape[0]
    h2 = params["l2_w"].shape[0]

    # Keep PyTorch (out, in) layout un-transposed; biases as column vectors.
    w1 = params["l1_w"]                 # (H1, Din)
    b1 = params["l1_b"][:, None]        # (H1, 1)
    w2 = params["l2_w"]                 # (H2, H1)
    b2 = params["l2_b"][:, None]        # (H2, 1)
    w3 = params["l3_w"]                 # (1, H2)
    b3 = params["l3_b"][:, None]        # (1, 1)

    # Batch tile: multiple of 128 lanes, capped at tile_b.
    tb = min(tile_b, _round_up(B, 128))
    b_pad = _round_up(B, tb)

    # One-time transpose (XLA) to feature-major; zero-pad the batch tail.
    xT = state.T                                                            # (Din, B)
    if b_pad != B:
        xT = jnp.pad(xT, ((0, 0), (0, b_pad - B)))

    grid = (b_pad // tb,)

    flops = 2 * b_pad * (din * h1 + h1 * h2 + h2) + 4 * b_pad * (h1 + h2)
    bytes_accessed = 4 * (b_pad * din + b_pad) + 4 * (h1 * din + h1 + h2 * h1 + h2 + h2 + 1)
    cost = pl.CostEstimate(flops=flops, transcendentals=b_pad, bytes_accessed=bytes_accessed)

    yT = pl.pallas_call(
        _discriminator_kernel,
        out_shape=jax.ShapeDtypeStruct((1, b_pad), jnp.float32),
        grid=grid,
        in_specs=[
            pl.BlockSpec((din, tb), lambda i: (0, i)),   # batch-tiled input
            pl.BlockSpec((h1, din), lambda i: (0, 0)),   # resident weights/biases
            pl.BlockSpec((h1, 1),   lambda i: (0, 0)),
            pl.BlockSpec((h2, h1),  lambda i: (0, 0)),
            pl.BlockSpec((h2, 1),   lambda i: (0, 0)),
            pl.BlockSpec((1, h2),   lambda i: (0, 0)),
            pl.BlockSpec((1, 1),    lambda i: (0, 0)),
        ],
        out_specs=pl.BlockSpec((1, tb), lambda i: (0, i)),  # lane-dense output row
        compiler_params=pltpu.CompilerParams(dimension_semantics=("parallel",)),
        cost_estimate=cost,
    )(xT, w1, b1, w2, b2, w3, b3)

    # Back to the module's (B, 1) layout; drop padded tail columns.
    return yT[0, :B][:, None]


def _reference_forward(state, params):
    h = state @ params["l1_w"].T + params["l1_b"]
    h = jnp.where(h > 0, h, 0.2 * h)
    h = h @ params["l2_w"].T + params["l2_b"]
    h = jnp.where(h > 0, h, 0.2 * h)
    y = h @ params["l3_w"].T + params["l3_b"]
    return jax.nn.sigmoid(y)


if __name__ == "__main__":
    # Shapes consistent with the module: env.state_dim=6, env.action_dim=2,
    # net_dim=[32, 32].
    state_dim, action_dim = 6, 2
    net_dim = (32, 32)
    din = state_dim + action_dim

    key = jax.random.PRNGKey(0)
    ks = jax.random.split(key, 8)

    # Deterministic synthetic parameters (PyTorch nn.Linear layout: (out, in)).
    params = {
        "l1_w": 0.1 * jax.random.normal(ks[0], (net_dim[0], din), jnp.float32),
        "l1_b": 0.1 * jax.random.normal(ks[1], (net_dim[0],), jnp.float32),
        "l2_w": 0.1 * jax.random.normal(ks[2], (net_dim[1], net_dim[0]), jnp.float32),
        "l2_b": 0.1 * jax.random.normal(ks[3], (net_dim[1],), jnp.float32),
        "l3_w": 0.1 * jax.random.normal(ks[4], (1, net_dim[1]), jnp.float32),
        "l3_b": 0.1 * jax.random.normal(ks[5], (1,), jnp.float32),
    }

    # Check 1: tiny batch (module-scale), pads up to one 128-lane tile.
    batch = 8
    state = jax.random.normal(ks[6], (batch, din), jnp.float32)
    out = jax.block_until_ready(discriminator_forward(state, params))
    ref = _reference_forward(state, params)
    assert out.shape == (batch, 1)
    assert jnp.allclose(out, ref, atol=1e-5, rtol=1e-5), (out, ref)

    # Check 2: batch not a multiple of the tile -> exercises grid + tail slicing.
    batch2 = 1000
    state2 = jax.random.normal(ks[7], (batch2, din), jnp.float32)
    out2 = jax.block_until_ready(discriminator_forward(state2, params))
    ref2 = _reference_forward(state2, params)
    assert out2.shape == (batch2, 1)
    assert jnp.allclose(out2, ref2, atol=1e-5, rtol=1e-5)

    print("KERNEL_OK")
</pallas_src>

<mosaic_0001>
module attributes {stable_mosaic.version = 11 : i64} {
  func.func @_discriminator_kernel(%arg0: i32, %arg1: memref<8x128xf32, #tpu.memory_space<vmem>>, %arg2: memref<32x8xf32, #tpu.memory_space<vmem>>, %arg3: memref<32x1xf32, #tpu.memory_space<vmem>>, %arg4: memref<32x32xf32, #tpu.memory_space<vmem>>, %arg5: memref<32x1xf32, #tpu.memory_space<vmem>>, %arg6: memref<1x32xf32, #tpu.memory_space<vmem>>, %arg7: memref<1x1xf32, #tpu.memory_space<vmem>>, %arg8: memref<1x128xf32, #tpu.memory_space<vmem>>) attributes {dimension_semantics = [#tpu.dimension_semantics<parallel>], iteration_bounds = array<i64: 1>, scalar_prefetch = 0 : i64, scratch_operands = 0 : i64, tpu.core_type = #tpu.core_type<tc>, window_params = [{transform_indices = @transform_0, window_bounds = array<i64: 8, 128>}, {pipeline_mode = #tpu.pipeline_mode<synchronous>, transform_indices = @transform_1, window_bounds = array<i64: 32, 8>}, {pipeline_mode = #tpu.pipeline_mode<synchronous>, transform_indices = @transform_2, window_bounds = array<i64: 32, 1>}, {pipeline_mode = #tpu.pipeline_mode<synchronous>, transform_indices = @transform_3, window_bounds = array<i64: 32, 32>}, {pipeline_mode = #tpu.pipeline_mode<synchronous>, transform_indices = @transform_4, window_bounds = array<i64: 32, 1>}, {pipeline_mode = #tpu.pipeline_mode<synchronous>, transform_indices = @transform_5, window_bounds = array<i64: 1, 32>}, {pipeline_mode = #tpu.pipeline_mode<synchronous>, transform_indices = @transform_6, window_bounds = array<i64: 1, 1>}, {transform_indices = @transform_7, window_bounds = array<i64: 1, 128>}]} {
    %c0 = arith.constant 0 : index
    %c0_0 = arith.constant 0 : index
    %0 = vector.load %arg1[%c0, %c0_0] : memref<8x128xf32, #tpu.memory_space<vmem>>, vector<8x128xf32>
    %c0_1 = arith.constant 0 : index
    %c0_2 = arith.constant 0 : index
    %1 = vector.load %arg2[%c0_1, %c0_2] : memref<32x8xf32, #tpu.memory_space<vmem>>, vector<32x8xf32>
    %cst = arith.constant dense<0.000000e+00> : vector<32x128xf32>
    %2 = tpu.matmul %1, %0, %cst {dimension_numbers = #tpu.dot_dimension_numbers<[1], [0], [0], [1], [0, 0, 1, 1], [], []>} : vector<32x8xf32>, vector<8x128xf32>, vector<32x128xf32> -> vector<32x128xf32>
    %c0_3 = arith.constant 0 : index
    %c0_4 = arith.constant 0 : index
    %3 = vector.load %arg3[%c0_3, %c0_4] : memref<32x1xf32, #tpu.memory_space<vmem>>, vector<32x1xf32>
    %4 = vector.broadcast %3 : vector<32x1xf32> to vector<32x128xf32>
    %5 = arith.addf %2, %4 : vector<32x128xf32>
    %cst_5 = arith.constant 0.000000e+00 : f32
    %6 = vector.broadcast %cst_5 : f32 to vector<32x128xf32>
    %7 = arith.cmpf ogt, %5, %6 : vector<32x128xf32>
    %cst_6 = arith.constant 2.000000e-01 : f32
    %8 = vector.broadcast %cst_6 : f32 to vector<32x128xf32>
    %9 = arith.mulf %8, %5 : vector<32x128xf32>
    %10 = arith.select %7, %5, %9 : vector<32x128xi1>, vector<32x128xf32>
    %c0_7 = arith.constant 0 : index
    %c0_8 = arith.constant 0 : index
    %11 = vector.load %arg4[%c0_7, %c0_8] : memref<32x32xf32, #tpu.memory_space<vmem>>, vector<32x32xf32>
    %cst_9 = arith.constant dense<0.000000e+00> : vector<32x128xf32>
    %12 = tpu.matmul %11, %10, %cst_9 {dimension_numbers = #tpu.dot_dimension_numbers<[1], [0], [0], [1], [0, 0, 1, 1], [], []>} : vector<32x32xf32>, vector<32x128xf32>, vector<32x128xf32> -> vector<32x128xf32>
    %c0_10 = arith.constant 0 : index
    %c0_11 = arith.constant 0 : index
    %13 = vector.load %arg5[%c0_10, %c0_11] : memref<32x1xf32, #tpu.memory_space<vmem>>, vector<32x1xf32>
    %14 = vector.broadcast %13 : vector<32x1xf32> to vector<32x128xf32>
    %15 = arith.addf %12, %14 : vector<32x128xf32>
    %cst_12 = arith.constant 0.000000e+00 : f32
    %16 = vector.broadcast %cst_12 : f32 to vector<32x128xf32>
    %17 = arith.cmpf ogt, %15, %16 : vector<32x128xf32>
    %cst_13 = arith.constant 2.000000e-01 : f32
    %18 = vector.broadcast %cst_13 : f32 to vector<32x128xf32>
    %19 = arith.mulf %18, %15 : vector<32x128xf32>
    %20 = arith.select %17, %15, %19 : vector<32x128xi1>, vector<32x128xf32>
    %c0_14 = arith.constant 0 : index
    %c0_15 = arith.constant 0 : index
    %21 = vector.load %arg6[%c0_14, %c0_15] : memref<1x32xf32, #tpu.memory_space<vmem>>, vector<1x32xf32>
    %cst_16 = arith.constant dense<0.000000e+00> : vector<1x128xf32>
    %22 = tpu.matmul %21, %20, %cst_16 {dimension_numbers = #tpu.dot_dimension_numbers<[1], [0], [0], [1], [0, 0, 1, 1], [], []>} : vector<1x32xf32>, vector<32x128xf32>, vector<1x128xf32> -> vector<1x128xf32>
    %c0_17 = arith.constant 0 : index
    %c0_18 = arith.constant 0 : index
    %23 = vector.load %arg7[%c0_17, %c0_18] : memref<1x1xf32, #tpu.memory_space<vmem>>, vector<1x1xf32>
    %24 = vector.broadcast %23 : vector<1x1xf32> to vector<1x128xf32>
    %25 = arith.addf %22, %24 : vector<1x128xf32>
    %26 = arith.negf %25 : vector<1x128xf32>
    %27 = math.exp %26 : vector<1x128xf32>
    %cst_19 = arith.constant 1.000000e+00 : f32
    %28 = vector.broadcast %cst_19 : f32 to vector<1x128xf32>
    %29 = arith.addf %28, %27 : vector<1x128xf32>
    %30 = arith.divf %28, %29 : vector<1x128xf32>
    %c0_20 = arith.constant 0 : index
    %c0_21 = arith.constant 0 : index
    %31 = vector.load %arg8[%c0_20, %c0_21] : memref<1x128xf32, #tpu.memory_space<vmem>>, vector<1x128xf32>
    tpu.vector_store %arg8[%c0_20, %c0_21], %30 {strides = array<i32>} : memref<1x128xf32, #tpu.memory_space<vmem>>, vector<1x128xf32>,
    return
  }
  func.func @transform_0(%arg0: i32) -> (i32, i32) {
    %c0_i32 = arith.constant 0 : i32
    %c0_i32_0 = arith.constant 0 : i32
    return %c0_i32, %arg0 : i32, i32
  }
  func.func @transform_1(%arg0: i32) -> (i32, i32) {
    %c0_i32 = arith.constant 0 : i32
    %c0_i32_0 = arith.constant 0 : i32
    %c0_i32_1 = arith.constant 0 : i32
    return %c0_i32, %c0_i32_0 : i32, i32
  }
  func.func @transform_2(%arg0: i32) -> (i32, i32) {
    %c0_i32 = arith.constant 0 : i32
    %c0_i32_0 = arith.constant 0 : i32
    %c0_i32_1 = arith.constant 0 : i32
    return %c0_i32, %c0_i32_0 : i32, i32
  }
  func.func @transform_3(%arg0: i32) -> (i32, i32) {
    %c0_i32 = arith.constant 0 : i32
    %c0_i32_0 = arith.constant 0 : i32
    %c0_i32_1 = arith.constant 0 : i32
    return %c0_i32, %c0_i32_0 : i32, i32
  }
  func.func @transform_4(%arg0: i32) -> (i32, i32) {
    %c0_i32 = arith.constant 0 : i32
    %c0_i32_0 = arith.constant 0 : i32
    %c0_i32_1 = arith.constant 0 : i32
    return %c0_i32, %c0_i32_0 : i32, i32
  }
  func.func @transform_5(%arg0: i32) -> (i32, i32) {
    %c0_i32 = arith.constant 0 : i32
    %c0_i32_0 = arith.constant 0 : i32
    %c0_i32_1 = arith.constant 0 : i32
    return %c0_i32, %c0_i32_0 : i32, i32
  }
  func.func @transform_6(%arg0: i32) -> (i32, i32) {
    %c0_i32 = arith.constant 0 : i32
    %c0_i32_0 = arith.constant 0 : i32
    %c0_i32_1 = arith.constant 0 : i32
    return %c0_i32, %c0_i32_0 : i32, i32
  }
  func.func @transform_7(%arg0: i32) -> (i32, i32) {
    %c0_i32 = arith.constant 0 : i32
    %c0_i32_0 = arith.constant 0 : i32
    return %c0_i32, %arg0 : i32, i32
  }
}

</mosaic_0001>

<bundles_post_ra>
// kernel: tpu_custom_call.1
= control target key start
LH: loop header
LB: loop body
LE: loop exit
PB: predicated region body
PF: predicated region fallthrough
CT: control target
= control target key end

     0   :  { %s422_s0 = inlined_call_operand.vmem [shape: f32[8,128], index: 0, kind: input, shape index: {}]   ;;  %s423_s1 = inlined_call_operand.vmem [shape: f32[32,8], index: 1, kind: input, shape index: {}]   ;;  %s424_s2 = inlined_call_operand.vmem [shape: f32[32,1], index: 2, kind: input, shape index: {}]   ;;  %s425_s3 = inlined_call_operand.vmem [shape: f32[32,32], index: 3, kind: input, shape index: {}]   ;;  %s426_s4 = inlined_call_operand.vmem [shape: f32[32,1], index: 4, kind: input, shape index: {}]   ;;  %s427_s5 = inlined_call_operand.vmem [shape: f32[1,32], index: 5, kind: input, shape index: {}]   ;;  %s428_s6 = inlined_call_operand.<no memory space> [shape: f32[1,1], index: 6, kind: input, shape index: {}]   ;;  %s429_s7 = inlined_call_operand.hbm [shape: f32[1,128], index: 7, kind: output, shape index: {}]  }
   0x1   :  { %v12_v0 = vstv %s428_s6 }
   0x2   :  { %13 = vst [vmem:[#allocation2] sm:$0x1] %v12_v0 }
   0x3   :  { %v29_v1 = vld [vmem:[%s422_s0] sm:$0xff]  ;;  %vm58_vm0 = vcmask 64512   ;;  %v33_v3 = vld [vmem:[%s423_s1 + $0x18] sm:$0xff]  ;;  %v35_v5 = vld [vmem:[%s424_s2 + $0x8] sm:$0xff]  ;;  %v311_v6 = vmov 0  }
   0x4   :  { %v30_v2 = vld [vmem:[%s423_s1] sm:$0xff]  ;;  %86 = vmatpush.msra.mxu0 %v29_v1  ;;  %271 = vmatpush.msra.mxu2 %v29_v1  ;;  %v37_v4 = vld [vmem:[%s424_s2 + $0x18] sm:$0xff] }
   0x5   :  { %261 = vmatmul.msk.f32.vlgmr.msra.gmra.mxu0 %vm58_vm0, %v30_v2  ;;  %264 = vmatmul.msk.f32.vlgmr.msra.gmra.mxu2 %vm58_vm0, %v33_v3 }
   0x6   :  { %279 = vset.pattern.permute.xlu1 %v311_v6  ;;  %278 = vset.pattern.permute.xlu0 %v311_v6 }
   0x7   :  { %14 = vsyncpa [#allocation4], 0  ;;  %55 = vperm.xlu0 %278, %v37_v4   ;;  %45 = vperm.xlu1 %279, %v35_v5   ;;  %v31_v7 = vld [vmem:[%s423_s1 + $0x8] sm:$0xff]  ;;  %v36_v8 = vld [vmem:[%s424_s2 + $0x10] sm:$0xff]  ;;  %vm140_vm5 = vcmask 261120   ;;  %s252_s0 = sshll.u32 %s429_s7, 4  ;;  %s253_s0 = int_to_ptr.hbm [resolvable:$true] %s252_s0 }
   0x8   :  { %280 = vset.pattern.permute.xlu2 %v311_v6  ;;  %v34_v9 = vld [vmem:[%s424_s2] sm:$0xff]  ;;  %v32_v10 = vld [vmem:[%s423_s1 + $0x10] sm:$0xff]  ;;  %v117_v11 = vld [vmem:[%s426_s4 + $0x8] sm:$0xff] }
   0x9   :  { %v116_v12 = vld [vmem:[%s426_s4] sm:$0xff]  ;;  %v119_v14 = vld [vmem:[%s426_s4 + $0x18] sm:$0xff]  ;;  %v118_v21 = vld [vmem:[%s426_s4 + $0x10] sm:$0xff] }
   0xa   :  { %137 = vperm.xlu2 %280, %v119_v14   ;;  %v195_v29 = vld [vmem:[#allocation2] sm:$0x1]  ;;  %v114_v36 = vld [vmem:[%s425_s3 + $0x10] sm:$0xff]  ;;  %v113_v38 = vld [vmem:[%s425_s3 + $0x8] sm:$0xff] }
   0xb   :  { %v112_v35 = vld [vmem:[%s425_s3] sm:$0xff]  ;;  %v115_v39 = vld [vmem:[%s425_s3 + $0x18] sm:$0xff] }
   0xc   :  { %v194_v59 = vld [vmem:[%s427_s5] sm:$0x1]  ;;  %s312_s5 = smov [#allocation3]  }
   0xd   :  { %262 = vmatmul.msk.f32.gmra.mxu0 %vm58_vm0, %v31_v7  ;;  %s250_s10 = sshll.u32 %s312_s5, 4  ;;  %s251_s10 = int_to_ptr.vmem [resolvable:$true] %s250_s10 }
   0xf   :  { %50 = vperm.xlu0 %278, %v36_v8   ;;  %40 = vperm.xlu1 %279, %v34_v9  }
  0x12   :  { %132 = vperm.xlu2 %280, %v118_v21  }
  0x15   :  { %263 = vmatmul.msk.f32.gmra.mxu0 %vm58_vm0, %v32_v10 }
  0x17   :  { %127 = vperm.xlu0 %278, %v117_v11   ;;  %122 = vperm.xlu1 %279, %v116_v12  }
  0x1a   :  { %198 = vperm.xlu2 %280, %v195_v29  }
  0x64   :  { %v138_v40 = vpop.permute.xlu2 %137 }
  0x6c   :  { %v133_v43 = vpop.permute.xlu2 %132 }
  0x74   :  { %v199_v61 = vpop.permute.xlu2 %198 }
  0x75   :  { %v201_v62 = vperm.slane %v199_v61, 0 }
  0x79   :  { %v46_v15 = vpop.permute.xlu1 %45  ;;  %v56_v16 = vpop.permute.xlu0 %55 }
  0x81   :  { %v41_v23 = vpop.permute.xlu1 %40  ;;  %v51_v25 = vpop.permute.xlu0 %50 }
  0x82   :  { %v88_v13 = vpop.f32.mrf.mxu0 }
  0x83   :  { %v89_v27 = vadd.f32 %v88_v13, %v41_v23 }
  0x85   :  { %v104_v33 = vmul.f32 0.2, %v89_v27  ;;  %vm100_vm4 = vcmp.gt.f32.partialorder %v89_v27, 0.0 }
  0x87   :  { %v108_v37 = vsel %vm100_vm4, %v89_v27, %v104_v33 }
  0x88   :  { %v97_v17 = vpop.f32.mrf.mxu2 }
  0x89   :  { %v98_v18 = vadd.f32 %v97_v17, %v56_v16  ;;  %v128_v46 = vpop.permute.xlu0 %127  ;;  %v123_v50 = vpop.permute.xlu1 %122 }
  0x8a   :  { %v91_v19 = vpop.f32.mrf.mxu0 }
  0x8b   :  { %vm103_vm1 = vcmp.gt.f32.partialorder %v98_v18, 0.0  ;;  %v107_v20 = vmul.f32 0.2, %v98_v18  ;;  %v92_v24 = vadd.f32 %v91_v19, %v46_v15 }
  0x8d   :  { %v111_v22 = vsel %vm103_vm1, %v98_v18, %v107_v20  ;;  %v105_v31 = vmul.f32 0.2, %v92_v24  ;;  %vm101_vm3 = vcmp.gt.f32.partialorder %v92_v24, 0.0 }
  0x8e   :  { %165 = vmatpush.msra.mxu1 %v111_v22  ;;  %272 = vmatpush.msra.mxu3 %v111_v22 }
  0x8f   :  { %v109_v34 = vsel %vm101_vm3, %v92_v24, %v105_v31 }
  0x92   :  { %v94_v26 = vpop.f32.mrf.mxu0 }
  0x93   :  { %v95_v28 = vadd.f32 %v94_v26, %v51_v25 }
  0x95   :  { %vm102_vm2 = vcmp.gt.f32.partialorder %v95_v28, 0.0  ;;  %v106_v30 = vmul.f32 0.2, %v95_v28 }
  0x97   :  { %v110_v32 = vsel %vm102_vm2, %v95_v28, %v106_v30 }
  0x98   :  { %166 = vmatpush.msra.mxu1 %v110_v32  ;;  %273 = vmatpush.msra.mxu3 %v110_v32 }
  0x9a   :  { %167 = vmatpush.msra.mxu1 %v109_v34  ;;  %274 = vmatpush.msra.mxu3 %v109_v34 }
  0x9c   :  { %168 = vmatpush.msra.mxu1 %v108_v37  ;;  %275 = vmatpush.msra.mxu3 %v108_v37 }
  0x9d   :  { %265 = vmatmul.msk.f32.vlgmr.msra.gmra.mxu1 %vm140_vm5, %v112_v35  ;;  %267 = vmatmul.msk.f32.vlgmr.msra.gmra.mxu3 %vm140_vm5, %v114_v36 }
  0xa5   :  { %266 = vmatmul.msk.f32.gmra.mxu1 %vm140_vm5, %v113_v38  ;;  %268 = vmatmul.msk.f32.gmra.mxu3 %vm140_vm5, %v115_v39 }
 0x11a   :  { %v170_v41 = vpop.f32.mrf.mxu1 }
 0x11b   :  { %v171_v51 = vadd.f32 %v170_v41, %v123_v50 }
 0x11d   :  { %v186_v57 = vmul.f32 0.2, %v171_v51  ;;  %vm182_vm9 = vcmp.gt.f32.partialorder %v171_v51, 0.0 }
 0x11f   :  { %v190_v60 = vsel %vm182_vm9, %v171_v51, %v186_v57 }
 0x120   :  { %v176_v42 = vpop.f32.mrf.mxu3 }
 0x121   :  { %v177_v45 = vadd.f32 %v176_v42, %v133_v43 }
 0x122   :  { %v173_v44 = vpop.f32.mrf.mxu1 }
 0x123   :  { %v174_v48 = vadd.f32 %v173_v44, %v128_v46  ;;  %v188_v53 = vmul.f32 0.2, %v177_v45  ;;  %vm184_vm7 = vcmp.gt.f32.partialorder %v177_v45, 0.0 }
 0x125   :  { %v187_v55 = vmul.f32 0.2, %v174_v48  ;;  %vm183_vm8 = vcmp.gt.f32.partialorder %v174_v48, 0.0  ;;  %v192_v56 = vsel %vm184_vm7, %v177_v45, %v188_v53 }
 0x127   :  { %v191_v58 = vsel %vm183_vm8, %v174_v48, %v187_v55 }
 0x128   :  { %v179_v47 = vpop.f32.mrf.mxu3 }
 0x129   :  { %v180_v49 = vadd.f32 %v179_v47, %v138_v40 }
 0x12b   :  { %vm185_vm6 = vcmp.gt.f32.partialorder %v180_v49, 0.0  ;;  %v189_v52 = vmul.f32 0.2, %v180_v49 }
 0x12d   :  { %v193_v54 = vsel %vm185_vm6, %v180_v49, %v189_v52 }
 0x12e   :  { %217 = vmatpush.msrb.mxu2 %v193_v54 }
 0x130   :  { %218 = vmatpush.msrb.mxu2 %v192_v56 }
 0x132   :  { %219 = vmatpush.msrb.mxu2 %v191_v58 }
 0x134   :  { %220 = vmatpush.msrb.mxu2 %v190_v60 }
 0x135   :  { %269 = vmatmul.msk.f32.vlgmr.msrb.gmra.mxu2 %vm140_vm5, %v194_v59 }
 0x1b8   :  { %v222_v63 = vpop.f32.mrf.mxu2 }
 0x1b9   :  { %v223_v0 = vadd.f32 %v222_v63, %v201_v62 }
 0x1bb   :  { %v270_v1 = vmul.f32 -1.442695, %v223_v0 }
 0x1bd   :  { %281 = vpow2.f32 %v270_v1 }
 0x1c3   :  { %v282_v2 = vpop.eup %281 }
 0x1c4   :  { %v228_v3 = vadd.f32 1.0, %v282_v2 }
 0x1c6   :  { %283 = vrcp.f32 %v228_v3  ;;  %v240_v7 = vand.u32 2147483648, %v228_v3  ;;  %v238_v9 = vand.u32 2147483647, %v228_v3  ;;  %vm234_vm11 = vweird.f32 %v228_v3 }
 0x1c8   :  { %v241_v11 = vor.u32 1.1754944e-38, %v240_v7  ;;  %vm239_vm13 = vcmp.eq.f32.partialorder %v238_v9, 8.507059e+37 }
 0x1cc   :  { %v284_v4 = vpop.eup %283 }
 0x1cd   :  { %v230_v5 = vmul.f32 %v284_v4, %v228_v3  ;;  %vm235_vm10 = vweird.f32 %v284_v4 }
 0x1ce   :  { %vm236_vm12 = vmor %vm234_vm11, %vm235_vm10 }
 0x1cf   :  { %v231_v6 = vsub.f32 1.0, %v230_v5 }
 0x1d1   :  { %v232_v8 = vmul.f32 %v284_v4, %v231_v6 }
 0x1d3   :  { %v233_v10 = vadd.f32 %v284_v4, %v232_v8 }
 0x1d5   :  { %v237_v12 = vsel %vm236_vm12, %v284_v4, %v233_v10 }
 0x1d6   :  { %v242_v13 = vsel %vm239_vm13, %v241_v11, %v237_v12 }
 0x1d7   :  { %244 = vst [vmem:[#allocation3] sm:$0x1] %v242_v13 }
 0x1d8   :  { %255 = dma.vmem_to_hbm [thread:$0]  %s251_s10, 16, %s253_s0, [#allocation4]  }
 0x1d9   :  { %309 = dma.done.wait [#allocation4], 16  }
 0x1da   :  { %310 = vsyncadd [#allocation4], 4294967280 }
 0x1db   :  { %260 = vsyncpa [#allocation4], 1 }

</bundles_post_ra>
